<compile_context>
chip_gen: v5e
topology: v5e:2x2
jax: 0.10.0
libtpu: 0.0.40
codegen_flags: <defaults>
</compile_context>

<pallas_src>
import math
import functools

import jax
import jax.numpy as jnp
from jax import lax
from jax.experimental import pallas as pl
from jax.experimental.pallas import tpu as pltpu

PI = math.pi
LOG2 = math.log(2.0)


def _round_up(v, m):
    return (v + m - 1) // m * m


def _shifted_softplus(v):
    # ShiftedSoftplus.forward: F.softplus(x) - log(2), numerically stable, f32.
    return jnp.logaddexp(v, 0.0) - LOG2


# ---------------------------------------------------------------------------
# 1) The module itself: elementwise ShiftedSoftplus as a tiled Pallas kernel.
# ---------------------------------------------------------------------------
def _ssp_kernel(x_ref, o_ref):
    o_ref[...] = _shifted_softplus(x_ref[...].astype(jnp.float32)).astype(o_ref.dtype)


def shifted_softplus(x, *, block_rows=256):
    rows, cols = x.shape
    br = _round_up(min(block_rows, rows), 8)
    return pl.pallas_call(
        _ssp_kernel,
        out_shape=jax.ShapeDtypeStruct(x.shape, x.dtype),
        grid=(pl.cdiv(rows, br),),
        in_specs=[pl.BlockSpec((br, cols), lambda i: (i, 0))],
        out_specs=pl.BlockSpec((br, cols), lambda i: (i, 0)),
    )(x)


# ---------------------------------------------------------------------------
# 2) Fused SchNet InteractionBlock forward (ShiftedSoftplus used in-kernel).
# ---------------------------------------------------------------------------
def _interaction_kernel(cutoff, n_edges,
                        x_ref, src_ref, dstT_ref, ew_ref, ea_ref,
                        w_m1_ref, b_m1_ref, w_m2_ref, b_m2_ref,
                        w_l1_ref, w_l2_ref, b_l2_ref,
                        w_lin_ref, b_lin_ref,
                        o_ref,
                        hx_ref, agg_ref):
    f32, bf16 = jnp.float32, jnp.bfloat16
    e_blk = pl.program_id(0)
    N = x_ref.shape[0]
    TE = ea_ref.shape[0]

    # --- block 0: project nodes once (lin1, no bias, bf16 feed), zero acc ----
    @pl.when(e_blk == 0)
    def _():
        hx_ref[...] = jnp.dot(x_ref[...].astype(bf16), w_l1_ref[...],
                              preferred_element_type=f32).astype(bf16)  # [N,Fp]
        agg_ref[...] = jnp.zeros_like(agg_ref)

    # --- validity of this tile (last tile may run past n_edges) --------------
    pos = e_blk * TE + lax.broadcasted_iota(jnp.int32, (TE, 1), 0)
    valid = pos < n_edges                                               # [TE,1]

    # --- edge filter network mlp(edge_attr): bf16 MXU feeds, f32 elementwise -
    h1 = jnp.dot(ea_ref[...].astype(bf16), w_m1_ref[...],
                 preferred_element_type=f32) + b_m1_ref[...]            # [TE,Fp]
    h1 = _shifted_softplus(h1)
    C = 0.5 * (jnp.cos(ew_ref[...] * (PI / cutoff)) + 1.0)              # [TE,1]
    W = (jnp.dot(h1.astype(bf16), w_m2_ref[...],
                 preferred_element_type=f32) + b_m2_ref[...]) * C       # [TE,Fp]
    # select (not multiply) so NaN/Inf from the out-of-bounds tail cannot leak
    W = jnp.where(valid, W, 0.0)

    # --- gather x_j = hx[src] via exact bf16 one-hot matmul -------------------
    iota_n = lax.broadcasted_iota(jnp.int32, (TE, N), 1)
    src_oh = (src_ref[...] == iota_n).astype(bf16)                      # [TE,N]
    x_j = jnp.dot(src_oh, hx_ref[...], preferred_element_type=f32)      # [TE,Fp]
    msg = x_j * W                                                       # message()

    # --- scatter-add at dst: transposed one-hot built directly (no XLU) ------
    iota_nT = lax.broadcasted_iota(jnp.int32, (N, TE), 0)
    dst_ohT = (dstT_ref[...] == iota_nT).astype(bf16)                   # [N,TE]
    agg_ref[...] += jnp.dot(dst_ohT, msg.astype(bf16),
                            preferred_element_type=f32)                 # [N,Fp]

    # --- last block: lin2 -> shifted-softplus -> lin, store ------------------
    @pl.when(e_blk == pl.num_programs(0) - 1)
    def _():
        h = jnp.dot(agg_ref[...].astype(bf16), w_l2_ref[...],
                    preferred_element_type=f32) + b_l2_ref[...]
        h = _shifted_softplus(h)
        out = jnp.dot(h.astype(bf16), w_lin_ref[...],
                      preferred_element_type=f32) + b_lin_ref[...]
        o_ref[...] = out.astype(o_ref.dtype)


def prepare_interaction_params(params):
    """One-time weight prep (pad filter dim to 128 lanes, cast MXU feeds to bf16)."""
    f32, bf16 = jnp.float32, jnp.bfloat16
    H, F = params["w_lin1"].shape
    G = params["w_mlp1"].shape[0]
    Fp = _round_up(F, 128)

    def pad_c(a, cols):
        return jnp.pad(a, ((0, 0), (0, cols - a.shape[1])))

    def pad_r(a, rows):
        return jnp.pad(a, ((0, rows - a.shape[0]), (0, 0)))

    return {
        "w_m1": pad_c(params["w_mlp1"].astype(f32), Fp).astype(bf16),          # (G,Fp)
        "b_m1": pad_c(params["b_mlp1"].astype(f32).reshape(1, F), Fp),         # (1,Fp)
        "w_m2": pad_r(pad_c(params["w_mlp2"].astype(f32), Fp), Fp).astype(bf16),
        "b_m2": pad_c(params["b_mlp2"].astype(f32).reshape(1, F), Fp),
        "w_l1": pad_c(params["w_lin1"].astype(f32), Fp).astype(bf16),          # (H,Fp)
        "w_l2": pad_r(params["w_lin2"].astype(f32), Fp).astype(bf16),          # (Fp,H)
        "b_l2": params["b_lin2"].astype(f32).reshape(1, H),
        "w_lin": params["w_lin"].astype(bf16),                                 # (H,H)
        "b_lin": params["b_lin"].astype(f32).reshape(1, H),
    }


def interaction_block(x, src, dst, edge_weight, edge_attr, prep, cutoff,
                      *, edge_tile=512):
    N, H = x.shape
    E, G = edge_attr.shape
    Fp = prep["w_m2"].shape[0]

    TE = _round_up(int(min(edge_tile, max(128, _round_up(E, 128)))), 128)
    n_eblk = pl.cdiv(E, TE)

    f32, i32 = jnp.float32, jnp.int32

    # Only per-call host prep: cheap reshapes / dtype checks of edge arrays.
    x32 = x.astype(f32)
    src2 = src.astype(i32).reshape(E, 1)
    dstT = dst.astype(i32).reshape(1, E)
    ew2 = edge_weight.astype(f32).reshape(E, 1)
    ea = edge_attr.astype(f32)

    inputs = (x32, src2, dstT, ew2, ea,
              prep["w_m1"], prep["b_m1"], prep["w_m2"], prep["b_m2"],
              prep["w_l1"], prep["w_l2"], prep["b_l2"],
              prep["w_lin"], prep["b_lin"])

    def const_spec(a):
        return pl.BlockSpec(a.shape, lambda e, nd=a.ndim: (0,) * nd)

    in_specs = [
        const_spec(x32),                                  # x: resident
        pl.BlockSpec((TE, 1), lambda e: (e, 0)),          # src (sublane-major)
        pl.BlockSpec((1, TE), lambda e: (0, e)),          # dst (lane-major)
        pl.BlockSpec((TE, 1), lambda e: (e, 0)),          # edge_weight
        pl.BlockSpec((TE, G), lambda e: (e, 0)),          # edge_attr, native G
    ] + [const_spec(a) for a in inputs[5:]]               # weights: resident

    Ep = n_eblk * TE
    flops = 2 * (Ep * G * Fp + Ep * Fp * Fp + N * H * Fp
                 + 2 * Ep * N * Fp + N * Fp * H + N * H * H)
    transcendentals = 2 * Ep * Fp + Ep + 2 * N * H        # softplus ~ exp+log, cos
    bytes_accessed = (4 * N * H
                      + E * (4 + 4 + 4 + 4 * G)
                      + 2 * (G * Fp + Fp * Fp + H * Fp + Fp * H + H * H)
                      + 4 * (2 * Fp + 2 * H)
                      + 4 * N * H)

    out = pl.pallas_call(
        functools.partial(_interaction_kernel, float(cutoff), int(E)),
        out_shape=jax.ShapeDtypeStruct((N, H), f32),
        grid_spec=pltpu.PrefetchScalarGridSpec(
            num_scalar_prefetch=0,
            grid=(n_eblk,),
            in_specs=in_specs,
            out_specs=pl.BlockSpec((N, H), lambda e: (0, 0)),
            scratch_shapes=[pltpu.VMEM((N, Fp), jnp.bfloat16),   # hx = x @ w_lin1
                            pltpu.VMEM((N, Fp), f32)],           # agg accumulator
        ),
        compiler_params=pltpu.CompilerParams(
            dimension_semantics=("arbitrary",)),          # edge axis = reduction
        cost_estimate=pl.CostEstimate(flops=flops,
                                      transcendentals=transcendentals,
                                      bytes_accessed=bytes_accessed),
    )(*inputs)

    return out


# ---------------------------------------------------------------------------
# References / test harness
# ---------------------------------------------------------------------------
def _xavier_uniform(key, fan_in, fan_out):
    bound = math.sqrt(6.0 / (fan_in + fan_out))
    return jax.random.uniform(key, (fan_in, fan_out), jnp.float32, -bound, bound)


def _reference(x, src, dst, edge_weight, edge_attr, p, cutoff, mxu_dtype=None):
    """Pure-JAX InteractionBlock forward; mxu_dtype mimics the kernel's bf16 feeds."""
    f32 = jnp.float32
    m = (lambda a: a) if mxu_dtype is None else (lambda a: a.astype(mxu_dtype))
    mm = lambda a, b: jnp.dot(m(a), m(b), preferred_element_type=f32)
    sp = lambda v: jnp.logaddexp(v, 0.0) - LOG2

    h1 = sp(mm(edge_attr, p["w_mlp1"]) + p["b_mlp1"])
    C = 0.5 * (jnp.cos(edge_weight * PI / cutoff) + 1.0)
    W = (mm(h1, p["w_mlp2"]) + p["b_mlp2"]) * C[:, None]
    hx = mm(x, p["w_lin1"])
    if mxu_dtype is not None:
        hx = hx.astype(mxu_dtype).astype(f32)
    msg = hx[src] * W
    if mxu_dtype is not None:
        msg = msg.astype(mxu_dtype).astype(f32)
    agg = jnp.zeros_like(hx).at[dst].add(msg)
    h = sp(mm(agg, p["w_lin2"]) + p["b_lin2"])
    return mm(h, p["w_lin"]) + p["b_lin"]


def _check(name, got, want, atol, rtol):
    err = float(jnp.max(jnp.abs(got - want)))
    tol = atol + rtol * float(jnp.max(jnp.abs(want)))
    assert err <= tol, f"{name}: max abs err {err} > tol {tol}"


if __name__ == "__main__":
    # Small shapes consistent with the module: hidden=32, gaussians=16,
    # filters=32, 16 nodes, 1200 edges -> 3 edge tiles of 512 (last partial).
    N, H, G, F, E = 16, 32, 16, 32, 1200
    cutoff = 10.0

    key = jax.random.PRNGKey(0)
    keys = jax.random.split(key, 11)

    params = {
        "w_mlp1": _xavier_uniform(keys[0], G, F),
        "b_mlp1": jnp.zeros((F,), jnp.float32),
        "w_mlp2": _xavier_uniform(keys[1], F, F),
        "b_mlp2": jnp.zeros((F,), jnp.float32),
        "w_lin1": _xavier_uniform(keys[2], H, F),   # CFConv.lin1 (no bias)
        "w_lin2": _xavier_uniform(keys[3], F, H),   # CFConv.lin2
        "b_lin2": jnp.zeros((H,), jnp.float32),
        "w_lin":  _xavier_uniform(keys[4], H, H),   # InteractionBlock.lin
        "b_lin":  jnp.zeros((H,), jnp.float32),
    }

    x = jax.random.normal(keys[5], (N, H), jnp.float32)
    src = jax.random.randint(keys[6], (E,), 0, N, jnp.int32)   # edge_index[0] = j
    dst = jax.random.randint(keys[7], (E,), 0, N, jnp.int32)   # edge_index[1] = i
    edge_weight = jax.random.uniform(keys[8], (E,), jnp.float32, 0.1, cutoff)
    edge_attr = jax.random.normal(keys[9], (E, G), jnp.float32)

    # --- standalone ShiftedSoftplus kernel (the module's exact forward) ------
    act_in = jax.random.normal(keys[10], (200, 32), jnp.float32)
    act_out = jax.block_until_ready(shifted_softplus(act_in, block_rows=64))
    act_ref = jnp.logaddexp(act_in, 0.0) - LOG2
    _check("shifted_softplus", act_out, act_ref, atol=1e-5, rtol=1e-5)

    # --- fused InteractionBlock kernel ----------------------------------------
    prep = prepare_interaction_params(params)        # one-time, hoisted out
    out = interaction_block(x, src, dst, edge_weight, edge_attr, prep, cutoff)
    out = jax.block_until_ready(out)
    assert out.shape == (N, H)

    ref_bf16 = _reference(x, src, dst, edge_weight, edge_attr, params, cutoff,
                          mxu_dtype=jnp.bfloat16)
    ref_f32 = _reference(x, src, dst, edge_weight, edge_attr, params, cutoff)

    # tight vs a reference mimicking the kernel's bf16 MXU feeds; loose vs the
    # pure-f32 module semantics.
    _check("interaction vs bf16-mimic", out, ref_bf16, atol=5e-2, rtol=2e-2)
    _check("interaction vs f32 module", out, ref_f32, atol=1e-1, rtol=5e-2)

    print("KERNEL_OK")
</pallas_src>

<mosaic_0001>
module attributes {stable_mosaic.version = 11 : i64} {
  func.func @_ssp_kernel(%arg0: i32, %arg1: memref<64x32xf32, #tpu.memory_space<vmem>>, %arg2: memref<64x32xf32, #tpu.memory_space<vmem>>) attributes {dimension_semantics = [#tpu.dimension_semantics<arbitrary>], iteration_bounds = array<i64: 4>, scalar_prefetch = 0 : i64, scratch_operands = 0 : i64, tpu.core_type = #tpu.core_type<tc>, window_params = [{transform_indices = @transform_0, window_bounds = array<i64: 64, 32>}, {transform_indices = @transform_1, window_bounds = array<i64: 64, 32>}]} {
    %c0 = arith.constant 0 : index
    %c0_0 = arith.constant 0 : index
    %0 = vector.load %arg1[%c0, %c0_0] : memref<64x32xf32, #tpu.memory_space<vmem>>, vector<64x32xf32>
    %cst = arith.constant 0.000000e+00 : f32
    %1 = vector.broadcast %cst : f32 to vector<64x32xf32>
    %2 = arith.maximumf %0, %1 : vector<64x32xf32>
    %3 = vector.broadcast %cst : f32 to vector<64x32xf32>
    %4 = arith.subf %0, %3 : vector<64x32xf32>
    %5 = arith.cmpf one, %4, %4 : vector<64x32xf32>
    %6 = vector.broadcast %cst : f32 to vector<64x32xf32>
    %7 = arith.addf %0, %6 : vector<64x32xf32>
    %8 = math.absf %4 : vector<64x32xf32>
    %cst_1 = arith.constant 0.000000e+00 : f32
    %9 = vector.broadcast %cst_1 : f32 to vector<64x32xf32>
    %10 = arith.subf %9, %8 : vector<64x32xf32>
    %11 = math.exp %10 : vector<64x32xf32>
    %12 = math.log1p %11 : vector<64x32xf32>
    %13 = arith.addf %2, %12 : vector<64x32xf32>
    %14 = arith.select %5, %7, %13 : vector<64x32xi1>, vector<64x32xf32>
    %cst_2 = arith.constant 0.693147182 : f32
    %15 = vector.broadcast %cst_2 : f32 to vector<64x32xf32>
    %16 = arith.subf %14, %15 : vector<64x32xf32>
    %c0_3 = arith.constant 0 : index
    %c0_4 = arith.constant 0 : index
    %17 = vector.load %arg2[%c0_3, %c0_4] : memref<64x32xf32, #tpu.memory_space<vmem>>, vector<64x32xf32>
    tpu.vector_store %arg2[%c0_3, %c0_4], %16 {strides = array<i32>} : memref<64x32xf32, #tpu.memory_space<vmem>>, vector<64x32xf32>,
    return
  }
  func.func @transform_0(%arg0: i32) -> (i32, i32) {
    %c0_i32 = arith.constant 0 : i32
    %c0_i32_0 = arith.constant 0 : i32
    return %arg0, %c0_i32 : i32, i32
  }
  func.func @transform_1(%arg0: i32) -> (i32, i32) {
    %c0_i32 = arith.constant 0 : i32
    %c0_i32_0 = arith.constant 0 : i32
    return %arg0, %c0_i32 : i32, i32
  }
}

</mosaic_0001>

<bundles_post_ra>
// kernel: tpu_custom_call.1
= control target key start
LH: loop header
LB: loop body
LE: loop exit
PB: predicated region body
PF: predicated region fallthrough
CT: control target
= control target key end

     0   :  { %s804_s6 = smov 0   ;;  %s806_s7 = smov 0   ;;  %s1049_s0 = inlined_call_operand.vmem [shape: f32[200,32], index: 0, kind: input, shape index: {}]   ;;  %s1050_s1 = inlined_call_operand.vmem [shape: f32[200,32], index: 1, kind: output, shape index: {}]  }
   0x1   :  { %s808_s8 = smov 0  }
   0x2 LB: > { %s817_s9 = sadd.s32 4294967295, %s760_s8   ;;  %s819_s10 = sadd.s32 1, %s760_s8   ;;  %s760_s8 = sphi %s808_s8, %s1070_s8   ;;  %s756_s7 = sphi %s806_s7, %s1069_s7   ;;  %s752_s6 = sphi %s804_s6, %s1068_s6  }
   0x3   : > { %s41_s11 = ssub.s32 %s760_s8, %s819_s10  ;;  %s44_s12 = sadd.s32 1, %s756_s7 }
   0x4   : > { %p42_p0 = scmp.eq.s32.totalorder %s41_s11, 0  ;;  %p54_p1 = scmp.ne.s32.totalorder %s756_s7, %s752_s6 }
   0x5   : > { %p55_p2 = scmp.eq.s32.totalorder %s817_s9, 3  ;;  %p554_p3 = scmp.ge.s32.totalorder %s760_s8, 1 }
   0x6   : > { %s827_s13 = scalar_select %p42_p0, %s756_s7, %s44_s12  }
   0x7   : > { %p829_p4 = por %p55_p2, %p54_p1  ;;  %p96_p5 = scmp.lt.s32.totalorder %s760_s8, 5 }
   0x9   : > { %p97_p6 = pnand %p554_p3, %p96_p5 }
   0xa   : > { %s834_s15 = sshll.u32 (!%p97_p6), %s817_s9, 3  ;;  %s116_s21 = sand.u32 (!%p97_p6), 1, %s752_s6  }
   0xb   : > { %100 = sbr.rel (%p97_p6) target bundleno = 118 (0x76), region = 24  ;;  %p124_p7 = scmp.lt.s32.totalorder (!%p97_p6), %s834_s15, 24 }
   0xc   : > { %s555_s22 = sshll.u32 (!%p97_p6), %s116_s21, 6 }
   0xd   : > { %s941_s23 = scalar_lea.vmem (!%p97_p6), [#allocation2], %s555_s22  }
  0x10   : > { %s125_s16 = scalar_select %p124_p7, %s834_s15, 24  ;;  %vm298_vm5 = vcmask 261120  }
  0x11   : > { %s315_s24 = ssub.s32 (%p829_p4), 25, %s834_s15  ;;  %s583_s25 = sshll.u32 (%p829_p4), %s817_s9, 6 }
  0x12   : > { %s557_s17 = sshll.u32 %s125_s16, 3  ;;  %p316_p8 = scmp.lt.s32.totalorder (%p829_p4), %s315_s24, 8 }
  0x13   : > { %s127_s20 = scalar_lea.vmem %s1049_s0, %s557_s17  ;;  %s995_s28 = scalar_lea.vmem (%p829_p4), %s1050_s1, %s583_s25  }
  0x14   : > { %v841_v0 = vld [vmem:[%s127_s20] sm:$0xff]  ;;  %v843_v1 = vld [vmem:[%s127_s20 + $0x8] sm:$0xff]  ;;  %v845_v2 = vld [vmem:[%s127_s20 + $0x10] sm:$0xff] }
  0x15   : > { %v170_v3 = vand.u32 2147483647, %v841_v0  ;;  %v848_v4 = vld [vmem:[%s127_s20 + $0x18] sm:$0xff]  ;;  %v171_v5 = vand.u32 2147483647, %v843_v1  ;;  %v851_v6 = vld [vmem:[%s127_s20 + $0x20] sm:$0xff]  ;;  %vm154_vm0 = vcmp.ne.f32.partialorder %v841_v0, %v841_v0  ;;  %vm155_vm2 = vcmp.ne.f32.partialorder %v843_v1, %v843_v1 }
  0x16   : > { %v172_v8 = vand.u32 2147483647, %v845_v2  ;;  %v854_v9 = vld [vmem:[%s127_s20 + $0x28] sm:$0xff]  ;;  %v173_v11 = vand.u32 2147483647, %v848_v4  ;;  %v859_v18 = vld [vmem:[%s127_s20 + $0x30] sm:$0xff]  ;;  %vm156_vm4 = vcmp.ne.f32.partialorder %v845_v2, %v845_v2  ;;  %vm157_vm7 = vcmp.ne.f32.partialorder %v848_v4, %v848_v4 }
  0x17   : > { %v178_v7 = vsub.f32 0.0, %v170_v3  ;;  %v179_v10 = vsub.f32 0.0, %v171_v5  ;;  %v174_v14 = vand.u32 2147483647, %v851_v6  ;;  %v175_v17 = vand.u32 2147483647, %v854_v9 }
  0x18   : > { %v180_v13 = vsub.f32 0.0, %v172_v8  ;;  %v181_v16 = vsub.f32 0.0, %v173_v11  ;;  %v861_v21 = vld [vmem:[%s127_s20 + $0x38] sm:$0xff]  ;;  %v176_v25 = vand.u32 2147483647, %v859_v18  ;;  %v146_v29 = vmax.f32 %v841_v0, 0.0 }
  0x19   : > { %v186_v12 = vmul.f32 1.442695, %v178_v7  ;;  %v188_v15 = vmul.f32 1.442695, %v179_v10  ;;  %v182_v20 = vsub.f32 0.0, %v174_v14  ;;  %v183_v23 = vsub.f32 0.0, %v175_v17 }
  0x1a   : > { %v190_v19 = vmul.f32 1.442695, %v180_v13  ;;  %v192_v22 = vmul.f32 1.442695, %v181_v16  ;;  %v177_v27 = vand.u32 2147483647, %v861_v21  ;;  %vm158_vm9 = vcmp.ne.f32.partialorder %v851_v6, %v851_v6 }
  0x1b   : > { %674 = vpow2.f32 %v186_v12  ;;  %v194_v24 = vmul.f32 1.442695, %v182_v20  ;;  %v196_v26 = vmul.f32 1.442695, %v183_v23  ;;  %v184_v28 = vsub.f32 0.0, %v176_v25 }
  0x1c   : > { %676 = vpow2.f32 %v188_v15  ;;  %v147_v30 = vmax.f32 %v843_v1, 0.0  ;;  %v148_v31 = vmax.f32 %v845_v2, 0.0  ;;  %v185_v32 = vsub.f32 0.0, %v177_v27 }
  0x1d   : > { %678 = vpow2.f32 %v190_v19  ;;  %v149_v34 = vmax.f32 %v848_v4, 0.0  ;;  %v150_v35 = vmax.f32 %v851_v6, 0.0  ;;  %v198_v36 = vmul.f32 1.442695, %v184_v28 }
  0x1e   : > { %680 = vpow2.f32 %v192_v22  ;;  %v151_v41 = vmax.f32 %v854_v9, 0.0  ;;  %v871_v49 = vmul.f32 1.442695, %v185_v32  ;;  %vm159_vm12 = vcmp.ne.f32.partialorder %v854_v9, %v854_v9 }
  0x1f   : > { %682 = vpow2.f32 %v194_v24  ;;  %vm160_vm14 = vcmp.ne.f32.partialorder %v859_v18, %v859_v18 }
  0x20   : > { %684 = vpow2.f32 %v196_v26 }
  0x21   : > { %v675_v33 = vpop.eup %674  ;;  %686 = vpow2.f32 %v198_v36 }
  0x22   : > { %v677_v37 = vpop.eup %676  ;;  %v202_v38 = vadd.f32 1.0, %v675_v33  ;;  %v205_v39 = vmul.f32 -0.5, %v675_v33  ;;  %v208_v40 = vand.u32 2147483647, %v675_v33 }
  0x23   : > { %v679_v42 = vpop.eup %678  ;;  %v211_v43 = vadd.f32 1.0, %v677_v37  ;;  %v214_v44 = vmul.f32 -0.5, %v677_v37  ;;  %v217_v45 = vand.u32 2147483647, %v677_v37 }
  0x24   : > { %v681_v46 = vpop.eup %680  ;;  %688 = vlog2.f32 %v202_v38  ;;  %v206_v47 = vadd.f32 1.0, %v205_v39  ;;  %v220_v48 = vadd.f32 1.0, %v679_v42  ;;  %vm875_vm1 = vcmp.lt.f32.partialorder %v208_v40, 0.0004427343 }
  0x25   : > { %v683_v50 = vpop.eup %682  ;;  %690 = vlog2.f32 %v211_v43  ;;  %v215_v52 = vadd.f32 1.0, %v214_v44  ;;  %v223_v53 = vmul.f32 -0.5, %v679_v42  ;;  %vm881_vm3 = vcmp.lt.f32.partialorder %v217_v45, 0.0004427343 }
  0x26   : > { %692 = vlog2.f32 %v220_v48  ;;  %v226_v55 = vand.u32 2147483647, %v679_v42  ;;  %v229_v56 = vadd.f32 1.0, %v681_v46  ;;  %v685_v57 = vpop.eup %684  ;;  %v207_v58 = vmul.f32 %v675_v33, %v206_v47 }
  0x27   : > { %v224_v59 = vadd.f32 1.0, %v223_v53  ;;  %v232_v60 = vmul.f32 -0.5, %v681_v46  ;;  %v235_v61 = vand.u32 2147483647, %v681_v46  ;;  %v216_v62 = vmul.f32 %v677_v37, %v215_v52  ;;  %v887_v5 = vpop.eup %686 }
  0x28   : > { %694 = vlog2.f32 %v229_v56  ;;  %v238_v63 = vadd.f32 1.0, %v683_v50  ;;  %v241_v3 = vmul.f32 -0.5, %v683_v50  ;;  %vm889_vm6 = vcmp.lt.f32.partialorder %v226_v55, 0.0004427343 }
  0x29   : > { %v225_v7 = vmul.f32 %v679_v42, %v224_v59  ;;  %v233_v10 = vadd.f32 1.0, %v232_v60  ;;  %v244_v11 = vand.u32 2147483647, %v683_v50  ;;  %v247_v14 = vadd.f32 1.0, %v685_v57 }
  0x2a   : > { %v689_v12 = vpop.eup %688  ;;  %696 = vlog2.f32 %v238_v63  ;;  %v242_v13 = vadd.f32 1.0, %v241_v3  ;;  %v250_v15 = vmul.f32 -0.5, %v685_v57  ;;  %vm896_vm8 = vcmp.lt.f32.partialorder %v235_v61, 0.0004427343 }
  0x2b   : > { %v691_v16 = vpop.eup %690  ;;  %v204_v17 = vmul.f32 0.6931472, %v689_v12  ;;  %v234_v19 = vmul.f32 %v681_v46, %v233_v10  ;;  %vm902_vm10 = vcmp.lt.f32.partialorder %v244_v11, 0.0004427343  ;;  %698 = vlog2.f32 %v247_v14 }
  0x2c   : > { %v693_v23 = vpop.eup %692  ;;  %v213_v24 = vmul.f32 0.6931472, %v691_v16  ;;  %v251_v25 = vadd.f32 1.0, %v250_v15  ;;  %v253_v26 = vand.u32 2147483647, %v685_v57  ;;  %v243_v32 = vmul.f32 %v683_v50, %v242_v13 }
  0x2d   : > { %v210_v27 = vsel %vm875_vm1, %v207_v58, %v204_v17  ;;  %v222_v28 = vmul.f32 0.6931472, %v693_v23  ;;  %v256_v33 = vadd.f32 1.0, %v887_v5  ;;  %v259_v40 = vmul.f32 -0.5, %v887_v5 }
  0x2e   : > { %v695_v36 = vpop.eup %694  ;;  %v274_v37 = vadd.f32 %v210_v27, %v146_v29  ;;  %v219_v38 = vsel %vm881_vm3, %v216_v62, %v213_v24  ;;  %v252_v39 = vmul.f32 %v685_v57, %v251_v25  ;;  %v262_v48 = vand.u32 2147483647, %v887_v5 }
  0x2f   : > { %v275_v42 = vadd.f32 %v219_v38, %v147_v30  ;;  %v228_v43 = vsel %vm889_vm6, %v225_v7, %v222_v28  ;;  %v231_v44 = vmul.f32 0.6931472, %v695_v36  ;;  %700 = vlog2.f32 %v256_v33 }
  0x30   : > { %v697_v45 = vpop.eup %696  ;;  %v282_v29 = vsel %vm154_vm0, %v841_v0, %v274_v37  ;;  %v276_v46 = vadd.f32 %v228_v43, %v148_v31  ;;  %v260_v47 = vadd.f32 1.0, %v259_v40  ;;  %vm937_vm11 = vcmp.lt.f32.partialorder %v253_v26, 0.0004427343 }
  0x31   : > { %v558_v50 = vadd.f32 -0.6931472, %v282_v29  ;;  %v283_v30 = vsel %vm155_vm2, %v843_v1, %v275_v42  ;;  %v237_v51 = vsel %vm896_vm8, %v234_v19, %v231_v44  ;;  %v240_v52 = vmul.f32 0.6931472, %v697_v45  ;;  %v699_v53 = vpop.eup %698 }
  0x32   : > { %v559_v54 = vadd.f32 -0.6931472, %v283_v30  ;;  %v284_v0 = vsel %vm156_vm4, %v845_v2, %v276_v46  ;;  %v277_v31 = vadd.f32 %v237_v51, %v149_v34  ;;  %v249_v57 = vmul.f32 0.6931472, %v699_v53 }
  0x33   : > { %299 = vst.msk [vmem:[%s941_s23] sm:$0xff] %vm298_vm5, %v558_v50  ;;  %v560_v1 = vadd.f32 -0.6931472, %v284_v0  ;;  %v246_v56 = vsel %vm902_vm10, %v243_v32, %v240_v52  ;;  %702 = vpow2.f32 %v871_v49  ;;  %v261_v58 = vmul.f32 %v887_v5, %v260_v47 }
  0x34   : > { %300 = vst.msk [vmem:[%s941_s23 + $0x8] sm:$0xff] %vm298_vm5, %v559_v54  ;;  %v285_v2 = vsel %vm157_vm7, %v848_v4, %v277_v31  ;;  %v278_v34 = vadd.f32 %v246_v56, %v150_v35  ;;  %v255_v60 = vsel %vm937_vm11, %v252_v39, %v249_v57  ;;  %v152_v61 = vmax.f32 %v859_v18, 0.0 }
  0x35   : > { %v701_v59 = vpop.eup %700  ;;  %301 = vst.msk [vmem:[%s941_s23 + $0x10] sm:$0xff] %vm298_vm5, %v560_v1  ;;  %v561_v49 = vadd.f32 -0.6931472, %v285_v2  ;;  %vm263_vm13 = vcmp.lt.f32.partialorder %v262_v48, 0.0004427343  ;;  %v279_v35 = vadd.f32 %v255_v60, %v151_v41  ;;  %v153_v16 = vmax.f32 %v861_v21, 0.0 }
  0x36   : > { %v286_v4 = vsel %vm158_vm9, %v851_v6, %v278_v34  ;;  %v258_v62 = vmul.f32 0.6931472, %v701_v59  ;;  %vm161_vm0 = vcmp.ne.f32.partialorder %v861_v21, %v861_v21 }
  0x37   : > { %302 = vst.msk [vmem:[%s941_s23 + $0x18] sm:$0xff] %vm298_vm5, %v561_v49  ;;  %v562_v63 = vadd.f32 -0.6931472, %v286_v4  ;;  %v287_v3 = vsel %vm159_vm12, %v854_v9, %v279_v35 }
  0x38   : > { %v264_v5 = vsel %vm263_vm13, %v261_v58, %v258_v62  ;;  %v563_v8 = vadd.f32 -0.6931472, %v287_v3 }
  0x39   : > { %v703_v7 = vpop.eup %702  ;;  %303 = vst.msk [vmem:[%s941_s23 + $0x20] sm:$0xff] %vm298_vm5, %v562_v63  ;;  %v280_v10 = vadd.f32 %v264_v5, %v152_v61 }
  0x3a   : > { %v265_v6 = vadd.f32 1.0, %v703_v7  ;;  %v268_v11 = vmul.f32 -0.5, %v703_v7  ;;  %304 = vst.msk [vmem:[%s941_s23 + $0x28] sm:$0xff] %vm298_vm5, %v563_v8  ;;  %v271_v9 = vand.u32 2147483647, %v703_v7 }
  0x3b   : > { %v288_v41 = vsel %vm160_vm14, %v859_v18, %v280_v10 }
  0x3c   : > { %v564_v12 = vadd.f32 -0.6931472, %v288_v41  ;;  %704 = vlog2.f32 %v265_v6  ;;  %v269_v13 = vadd.f32 1.0, %v268_v11  ;;  %vm272_vm15 = vcmp.lt.f32.partialorder %v271_v9, 0.0004427343 }
  0x3e   : > { %305 = vst.msk [vmem:[%s941_s23 + $0x30] sm:$0xff] %vm298_vm5, %v564_v12  ;;  %v270_v14 = vmul.f32 %v703_v7, %v269_v13 }
  0x42   : > { %v705_v15 = vpop.eup %704 }
  0x43   : > { %v267_v17 = vmul.f32 0.6931472, %v705_v15 }
  0x45   : > { %v273_v19 = vsel %vm272_vm15, %v270_v14, %v267_v17 }
  0x46   : > { %v281_v20 = vadd.f32 %v273_v19, %v153_v16 }
  0x47   : > { %313 = sbr.rel (!%p829_p4) target bundleno = 118 (0x76), region = 28 }
  0x48   : > { %v289_v18 = vsel %vm161_vm0, %v861_v21, %v281_v20 }
  0x49   : > { %v565_v22 = vadd.f32 -0.6931472, %v289_v18 }
  0x4b   : > { %306 = vst.msk [vmem:[%s941_s23 + $0x38] sm:$0xff] %vm298_vm5, %v565_v22 }
  0x4c   : > { %s1072_s24 = smov (!%p316_p8, %s315_s24), 8 }
  0x4d   : > { %s568_s29 = sshll.u32 %s1072_s24, 3 }
  0x4e   : > { %p571_p9 = scmp.eq.s32.totalorder %s568_s29, 0 }
  0x4f   : > { %s1001_s30 = sshrl.u32 (!%p571_p9), %s1072_s24, 3 }
  0x50   : > { %324 = sbr.rel (%p571_p9) target bundleno = 118 (0x76), region = 32  ;;  %p572_p10 = scmp.le.s32.totalorder (!%p571_p9), %s1001_s30, 0 }
  0x55   : > { %507 = sbr.rel (%p572_p10) target bundleno = 101 (0x65), region = 108  ;;  %s1064_s2 = smov (!%p572_p10), %s995_s28 }
  0x56   : > { %s1065_s3 = smov (!%p572_p10), %s941_s23  ;;  %s1010_s4 = smov (!%p572_p10), 0  }
  0x57   : > { %s1012_s5 = smov (!%p572_p10), 0  }
  0x5a LB: >> { %v401_v21 = vld [vmem:[%s768_s3] sm:$0xff]  ;;  %v403_v23 = vld [vmem:[%s768_s3 + $0x8] sm:$0xff]  ;;  %v405_v24 = vld [vmem:[%s768_s3 + $0x10] sm:$0xff]  ;;  %s417_s6 = sadd.s32 1, %s772_s4  ;;  %s395_s5 = sadd.s32 1, %s776_s5   ;;  %s776_s5 = sphi %s1012_s5, %s395_s5   ;;  %s772_s4 = sphi %s1010_s4, %s1067_s4   ;;  %s768_s3 = sphi %s1065_s3, %s422_s3   ;;  %s764_s2 = sphi %s1064_s2, %s1066_s2  }
  0x5b   : >> { %402 = vst [vmem:[%s764_s2] sm:$0xff] %v401_v21  ;;  %v407_v25 = vld [vmem:[%s768_s3 + $0x18] sm:$0xff]  ;;  %p418_p11 = scmp.ge.s32.totalorder %s417_s6, %s1001_s30  ;;  %v409_v26 = vld [vmem:[%s768_s3 + $0x20] sm:$0xff]  ;;  %v411_v27 = vld [vmem:[%s768_s3 + $0x28] sm:$0xff]  ;;  %p394_p12 = scmp.ge.s32.totalorder %s395_s5, %s1001_s30 }
  0x5c   : >> { %404 = vst [vmem:[%s764_s2 + $0x8] sm:$0xff] %v403_v23  ;;  %v413_v28 = vld [vmem:[%s768_s3 + $0x30] sm:$0xff]  ;;  %v415_v32 = vld [vmem:[%s768_s3 + $0x38] sm:$0xff] }
  0x5d   : >> { %406 = vst [vmem:[%s764_s2 + $0x10] sm:$0xff] %v405_v24  ;;  %s1074_s6 = smov (%p418_p11, %s417_s6), 0 }
  0x5e   : >> { %408 = vst [vmem:[%s764_s2 + $0x18] sm:$0xff] %v407_v25  ;;  %s573_s8 = sshll.u32 %s1074_s6, 6  ;;  %s1067_s4 = smov %s1074_s6 }
  0x5f   : >> { %410 = vst [vmem:[%s764_s2 + $0x20] sm:$0xff] %v409_v26  ;;  %s422_s3 = scalar_lea.vmem %s941_s23, %s573_s8 [#allocation2]   ;;  %s423_s9 = scalar_lea.vmem %s995_s28, %s573_s8  }
  0x60   : >> { %412 = vst [vmem:[%s764_s2 + $0x28] sm:$0xff] %v411_v27  ;;  %397 = sbr.rel (!%p394_p12) target bundleno = 90 (0x5a), region = 114 }
  0x61   : >> { %414 = vst [vmem:[%s764_s2 + $0x30] sm:$0xff] %v413_v28 }
  0x62   : >> { %416 = vst [vmem:[%s764_s2 + $0x38] sm:$0xff] %v415_v32  ;;  %s1066_s2 = smov %s423_s9 }
  0x65 PF: > { %s1031_s11 = sand.u32 7, %s1072_s24   ;;  %s584_s12 = sshll.u32 %s1001_s30, 6 }
  0x66   : > { %s428_s14 = scalar_lea.vmem %s941_s23, %s584_s12 [#allocation2]   ;;  %s430_s15 = scalar_lea.vmem %s995_s28, %s584_s12  }
  0x67   : > { %p578_p13 = scmp.le.s32.totalorder %s1031_s11, 0 }
  0x68   : > { %s778_s16 = smov (!%p578_p13), %s430_s15   ;;  %s782_s17 = smov (!%p578_p13), %s428_s14  }
  0x69   : > { %521 = sbr.rel (%p578_p13) target bundleno = 118 (0x76), region = 119  ;;  %s786_s18 = smov (!%p578_p13), 0  }
  0x6a   : > { %s790_s19 = smov (!%p578_p13), 0  }
  0x6e LB: >> { %v440_v33 = vld [vmem:[%s784_s17] sm:$0xff]  ;;  %s442_s20 = sadd.s32 1, %s788_s18  ;;  %s434_s19 = sadd.s32 1, %s792_s19   ;;  %s792_s19 = sphi %s790_s19, %s434_s19   ;;  %s788_s18 = sphi %s786_s18, %s787_s18   ;;  %s784_s17 = sphi %s782_s17, %s447_s17   ;;  %s780_s16 = sphi %s778_s16, %s448_s16  }
  0x6f   : >> { %441 = vst [vmem:[%s780_s16] sm:$0xff] %v440_v33  ;;  %p443_p0 = scmp.ge.s32.totalorder %s442_s20, %s1031_s11  ;;  %p433_p1 = scmp.ge.s32.totalorder %s434_s19, %s1031_s11 }
  0x71   : >> { %s1076_s20 = smov (%p443_p0, %s442_s20), 0  ;;  %436 = sbr.rel (!%p433_p1) target bundleno = 110 (0x6e), region = 125 }
  0x72   : >> { %s579_s21 = sshll.u32 %s1076_s20, 3  ;;  %s787_s18 = smov %s1076_s20  }
  0x73   : >> { %s447_s17 = scalar_lea.vmem %s428_s14, %s579_s21 [#allocation2]   ;;  %s448_s16 = scalar_lea.vmem %s430_s15, %s579_s21  }
  0x76 PF: > { %p8_p2 = scmp.ge.s32.totalorder %s819_s10, 6   ;;  %s1068_s6 = smov %s756_s7 }
  0x77   : > { %s1069_s7 = smov %s827_s13  ;;  %s1070_s8 = smov %s819_s10 }
  0x78   :  { %10 = sbr.rel (!%p8_p2) target bundleno = 2 (0x2), region = 136 }

</bundles_post_ra>
